<compile_context>
chip_gen: v7x
topology: tpu7x:2x2x1
jax: 0.10.0
libtpu: 0.0.40
codegen_flags: <defaults>
</compile_context>

<pallas_src>
import jax
import jax.numpy as jnp
from jax.experimental import pallas as pl
from jax.experimental.pallas import tpu as pltpu

LANE = 128  # TPU lane width


def _round_up(n, m):
    return ((n + m - 1) // m) * m


def policy_net_kernel(x_ref, w1_ref, b1_ref, w2_ref, b2_ref, o_ref):
    # fc1: in-kernel f32 -> bf16 cast (cheap VPU op) feeding the MXU, f32 accumulation.
    x = x_ref[...].astype(jnp.bfloat16)                      # (TB, S)
    h = jnp.dot(x, w1_ref[...], preferred_element_type=jnp.float32)
    h = jnp.maximum(h + b1_ref[...], 0.0)                    # (TB, Hp) f32, padded cols are 0
    # fc2 (cast h to bf16 for the MXU, accumulate in f32); action dim left unpadded.
    logits = jnp.dot(h.astype(w2_ref.dtype), w2_ref[...],
                     preferred_element_type=jnp.float32)
    logits = logits + b2_ref[...]                            # (TB, A)
    # numerically stable softmax over the action axis
    m = jnp.max(logits, axis=1, keepdims=True)
    e = jnp.exp(logits - m)
    denom = jnp.sum(e, axis=1, keepdims=True)
    # exact reciprocal: denom is (TB, 1) so the precise divide is essentially free,
    # and output rows sum to 1 at f32 precision.
    o_ref[...] = (e * pl.reciprocal(denom)).astype(o_ref.dtype)


def prepare_params(w1_t, b1, w2_t, b2):
    """One-time layout prep (hoisted out of the per-step forward): pad the hidden dim to a
    lane-dense 128 and cast matmul operands to bf16. Call once; reuse the results per step."""
    S, H = w1_t.shape
    A = w2_t.shape[1]
    Hp = _round_up(max(H, LANE), LANE)
    w1p = jnp.zeros((S, Hp), jnp.bfloat16).at[:, :H].set(w1_t.astype(jnp.bfloat16))
    b1p = jnp.zeros((1, Hp), jnp.float32).at[0, :H].set(b1.astype(jnp.float32))
    w2p = jnp.zeros((Hp, A), jnp.bfloat16).at[:H, :].set(w2_t.astype(jnp.bfloat16))
    b2p = b2.astype(jnp.float32).reshape(1, A)
    return w1p, b1p, w2p, b2p


def policy_net_forward(x, w1p, b1p, w2p, b2p, *, block_b=1024):
    """x: [B, state_dim] f32; w1p: [S, Hp] bf16; b1p: [1, Hp] f32; w2p: [Hp, A] bf16;
       b2p: [1, A] f32 (from prepare_params). Returns [B, A] f32 softmax probs."""
    B, S = x.shape
    Hp = w1p.shape[1]
    A = w2p.shape[1]

    # Batch tile: big enough to amortize per-step pipeline overhead, but capped so the grid
    # has >= 2 steps and the "parallel" batch axis shards across both v7x TensorCores.
    TB = min(block_b, max(16, _round_up(pl.cdiv(B, 2), 16)))
    grid = (pl.cdiv(B, TB),)  # partial last block is masked by Pallas; no batch padding

    return pl.pallas_call(
        policy_net_kernel,
        out_shape=jax.ShapeDtypeStruct((B, A), jnp.float32),
        grid=grid,
        in_specs=[
            pl.BlockSpec((TB, S), lambda i: (i, 0)),   # x tile advances with grid; S unpadded
            pl.BlockSpec((S, Hp), lambda i: (0, 0)),   # weights/biases stay VMEM-resident
            pl.BlockSpec((1, Hp), lambda i: (0, 0)),
            pl.BlockSpec((Hp, A), lambda i: (0, 0)),
            pl.BlockSpec((1, A), lambda i: (0, 0)),
        ],
        # Output block spans the full action dim -> contiguous (B, A) HBM write, no padding.
        out_specs=pl.BlockSpec((TB, A), lambda i: (i, 0)),
        compiler_params=pltpu.CompilerParams(
            dimension_semantics=("parallel",),         # shard batch tiles across TCs (v7x)
        ),
    )(x, w1p, b1p, w2p, b2p)


def init_params(key, state_dim, hidden_dim, action_dim):
    """Deterministic init mimicking torch.nn.Linear default (U(-1/sqrt(fan_in), 1/sqrt(fan_in)))."""
    k1, k2, k3, k4 = jax.random.split(key, 4)
    bound1 = 1.0 / jnp.sqrt(state_dim)
    bound2 = 1.0 / jnp.sqrt(hidden_dim)
    # stored already transposed: [in, out]
    w1_t = jax.random.uniform(k1, (state_dim, hidden_dim), jnp.float32, -bound1, bound1)
    b1 = jax.random.uniform(k2, (hidden_dim,), jnp.float32, -bound1, bound1)
    w2_t = jax.random.uniform(k3, (hidden_dim, action_dim), jnp.float32, -bound2, bound2)
    b2 = jax.random.uniform(k4, (action_dim,), jnp.float32, -bound2, bound2)
    return w1_t, b1, w2_t, b2


# TODO(synk): save_checkpoint / load_checkpoint (torch.save/torch.load) have no Pallas
# equivalent; persistence should be handled outside the kernel with standard JAX utilities.

if __name__ == "__main__":
    key = jax.random.PRNGKey(0)
    k_x, k_p = jax.random.split(key)

    batch, state_dim, hidden_dim, action_dim = 256, 16, 32, 8
    x = jax.random.normal(k_x, (batch, state_dim), jnp.float32)
    w1_t, b1, w2_t, b2 = init_params(k_p, state_dim, hidden_dim, action_dim)

    # One-time param prep (padding + bf16 cast) outside the jitted per-step forward.
    w1p, b1p, w2p, b2p = prepare_params(w1_t, b1, w2_t, b2)

    fwd = jax.jit(policy_net_forward)
    out = fwd(x, w1p, b1p, w2p, b2p)
    out = jax.block_until_ready(out)

    # pure-JAX f32 reference of the same forward pass (kernel uses bf16 matmul operands,
    # so tolerance is relaxed accordingly)
    h_ref = jnp.maximum(x @ w1_t + b1, 0.0)
    ref = jax.nn.softmax(h_ref @ w2_t + b2, axis=1)
    assert out.shape == (batch, action_dim)
    assert jnp.allclose(out, ref, atol=2e-2), "mismatch vs JAX reference"
    assert jnp.allclose(jnp.sum(out, axis=1), 1.0, atol=1e-4), "rows must sum to ~1"

    print("KERNEL_OK")
</pallas_src>

<mosaic_0001>
module attributes {stable_mosaic.version = 11 : i64} {
  func.func @policy_net_kernel(%arg0: i32, %arg1: memref<128x16xf32, #tpu.memory_space<vmem>>, %arg2: memref<16x128xbf16, #tpu.memory_space<vmem>>, %arg3: memref<1x128xf32, #tpu.memory_space<vmem>>, %arg4: memref<128x8xbf16, #tpu.memory_space<vmem>>, %arg5: memref<1x8xf32, #tpu.memory_space<vmem>>, %arg6: memref<128x8xf32, #tpu.memory_space<vmem>>) attributes {dimension_semantics = [#tpu.dimension_semantics<parallel>], iteration_bounds = array<i64: 2>, scalar_prefetch = 0 : i64, scratch_operands = 0 : i64, tpu.core_type = #tpu.core_type<tc>, window_params = [{transform_indices = @transform_0, window_bounds = array<i64: 128, 16>}, {pipeline_mode = #tpu.pipeline_mode<synchronous>, transform_indices = @transform_1, window_bounds = array<i64: 16, 128>}, {pipeline_mode = #tpu.pipeline_mode<synchronous>, transform_indices = @transform_2, window_bounds = array<i64: 1, 128>}, {pipeline_mode = #tpu.pipeline_mode<synchronous>, transform_indices = @transform_3, window_bounds = array<i64: 128, 8>}, {pipeline_mode = #tpu.pipeline_mode<synchronous>, transform_indices = @transform_4, window_bounds = array<i64: 1, 8>}, {transform_indices = @transform_5, window_bounds = array<i64: 128, 8>}]} {
    %c0 = arith.constant 0 : index
    %c0_0 = arith.constant 0 : index
    %0 = vector.load %arg1[%c0, %c0_0] : memref<128x16xf32, #tpu.memory_space<vmem>>, vector<128x16xf32>
    %1 = arith.truncf %0 : vector<128x16xf32> to vector<128x16xbf16>
    %c0_1 = arith.constant 0 : index
    %c0_2 = arith.constant 0 : index
    %2 = vector.load %arg2[%c0_1, %c0_2] : memref<16x128xbf16, #tpu.memory_space<vmem>>, vector<16x128xbf16>
    %cst = arith.constant dense<0.000000e+00> : vector<128x128xf32>
    %3 = tpu.matmul %1, %2, %cst {dimension_numbers = #tpu.dot_dimension_numbers<[1], [0], [0], [1], [0, 0, 1, 1], [], []>} : vector<128x16xbf16>, vector<16x128xbf16>, vector<128x128xf32> -> vector<128x128xf32>
    %c0_3 = arith.constant 0 : index
    %c0_4 = arith.constant 0 : index
    %4 = vector.load %arg3[%c0_3, %c0_4] : memref<1x128xf32, #tpu.memory_space<vmem>>, vector<1x128xf32>
    %5 = vector.broadcast %4 : vector<1x128xf32> to vector<128x128xf32>
    %6 = arith.addf %3, %5 : vector<128x128xf32>
    %cst_5 = arith.constant 0.000000e+00 : f32
    %7 = vector.broadcast %cst_5 : f32 to vector<128x128xf32>
    %8 = arith.maximumf %6, %7 : vector<128x128xf32>
    %9 = arith.truncf %8 : vector<128x128xf32> to vector<128x128xbf16>
    %c0_6 = arith.constant 0 : index
    %c0_7 = arith.constant 0 : index
    %10 = vector.load %arg4[%c0_6, %c0_7] : memref<128x8xbf16, #tpu.memory_space<vmem>>, vector<128x8xbf16>
    %cst_8 = arith.constant dense<0.000000e+00> : vector<128x8xf32>
    %11 = tpu.matmul %9, %10, %cst_8 {dimension_numbers = #tpu.dot_dimension_numbers<[1], [0], [0], [1], [0, 0, 1, 1], [], []>} : vector<128x128xbf16>, vector<128x8xbf16>, vector<128x8xf32> -> vector<128x8xf32>
    %c0_9 = arith.constant 0 : index
    %c0_10 = arith.constant 0 : index
    %12 = vector.load %arg5[%c0_9, %c0_10] : memref<1x8xf32, #tpu.memory_space<vmem>>, vector<1x8xf32>
    %13 = vector.broadcast %12 : vector<1x8xf32> to vector<128x8xf32>
    %14 = arith.addf %11, %13 : vector<128x8xf32>
    %cst_11 = arith.constant dense<0xFF800000> : vector<128xf32>
    %15 = vector.multi_reduction <maximumf>, %14, %cst_11 [1] : vector<128x8xf32> to vector<128xf32>
    %16 = vector.shape_cast %15 : vector<128xf32> to vector<128x1xf32>
    %17 = vector.broadcast %16 : vector<128x1xf32> to vector<128x8xf32>
    %18 = arith.subf %14, %17 : vector<128x8xf32>
    %19 = math.exp %18 : vector<128x8xf32>
    %cst_12 = arith.constant dense<0.000000e+00> : vector<128xf32>
    %20 = vector.multi_reduction <add>, %19, %cst_12 [1] : vector<128x8xf32> to vector<128xf32>
    %21 = vector.shape_cast %20 : vector<128xf32> to vector<128x1xf32>
    %22 = tpu.reciprocal %21 : vector<128x1xf32> -> vector<128x1xf32>
    %23 = vector.broadcast %22 : vector<128x1xf32> to vector<128x8xf32>
    %24 = arith.mulf %19, %23 : vector<128x8xf32>
    %c0_13 = arith.constant 0 : index
    %c0_14 = arith.constant 0 : index
    %25 = vector.load %arg6[%c0_13, %c0_14] : memref<128x8xf32, #tpu.memory_space<vmem>>, vector<128x8xf32>
    tpu.vector_store %arg6[%c0_13, %c0_14], %24 {strides = array<i32>} : memref<128x8xf32, #tpu.memory_space<vmem>>, vector<128x8xf32>,
    return
  }
  func.func @transform_0(%arg0: i32) -> (i32, i32) {
    %c0_i32 = arith.constant 0 : i32
    %c0_i32_0 = arith.constant 0 : i32
    return %arg0, %c0_i32 : i32, i32
  }
  func.func @transform_1(%arg0: i32) -> (i32, i32) {
    %c0_i32 = arith.constant 0 : i32
    %c0_i32_0 = arith.constant 0 : i32
    %c0_i32_1 = arith.constant 0 : i32
    return %c0_i32, %c0_i32_0 : i32, i32
  }
  func.func @transform_2(%arg0: i32) -> (i32, i32) {
    %c0_i32 = arith.constant 0 : i32
    %c0_i32_0 = arith.constant 0 : i32
    %c0_i32_1 = arith.constant 0 : i32
    return %c0_i32, %c0_i32_0 : i32, i32
  }
  func.func @transform_3(%arg0: i32) -> (i32, i32) {
    %c0_i32 = arith.constant 0 : i32
    %c0_i32_0 = arith.constant 0 : i32
    %c0_i32_1 = arith.constant 0 : i32
    return %c0_i32, %c0_i32_0 : i32, i32
  }
  func.func @transform_4(%arg0: i32) -> (i32, i32) {
    %c0_i32 = arith.constant 0 : i32
    %c0_i32_0 = arith.constant 0 : i32
    %c0_i32_1 = arith.constant 0 : i32
    return %c0_i32, %c0_i32_0 : i32, i32
  }
  func.func @transform_5(%arg0: i32) -> (i32, i32) {
    %c0_i32 = arith.constant 0 : i32
    %c0_i32_0 = arith.constant 0 : i32
    return %arg0, %c0_i32 : i32, i32
  }
}

</mosaic_0001>

<bundles_post_ra>
// kernel: policy_net_forward.1
= control target key start
LH: loop header
LB: loop body
LE: loop exit
PB: predicated region body
PF: predicated region fallthrough
CT: control target
= control target key end

     0   :  { %s1071_s18 = smov 0   ;;  %s1348_s0 = inlined_call_operand.vmem [shape: f32[256,16], index: 0, kind: input, shape index: {}]   ;;  %s1349_s1 = inlined_call_operand.vmem [shape: bf16[16,128], index: 1, kind: input, shape index: {}]   ;;  %s1350_s2 = inlined_call_operand.vmem [shape: f32[1,128], index: 2, kind: input, shape index: {}]   ;;  %s1351_s3 = inlined_call_operand.vmem [shape: bf16[128,8], index: 3, kind: input, shape index: {}]   ;;  %s1352_s4 = inlined_call_operand.vmem [shape: f32[1,8], index: 4, kind: input, shape index: {}]   ;;  %s1353_s5 = inlined_call_operand.vmem [shape: f32[256,8], index: 5, kind: output, shape index: {}]  }
   0x1 LB: > { %s831_s19 = sadd.s32 4294967295, %s1039_s18   ;;  %p835_p0 = scmp.ge.s32.totalorder %s1039_s18, 1  ;;  %s1039_s18 = sphi %s1071_s18, %s15_s18  }
   0x2   : > { %p188_p1 = scmp.lt.s32.totalorder %s1039_s18, 3 }
   0x4   : > { %p189_p2 = pnand %p835_p0, %p188_p1 }
   0x5   : > { %v960_v0 = vld [vmem:[%s1349_s1] sm:$0xff] (!%p189_p2)   ;;  %s836_s22 = sshll.u32 (!%p189_p2), %s831_s19, 4  ;;  %v962_v2 = vld [vmem:[%s1351_s3 + $0x8] sm:$0xff] (!%p189_p2)   ;;  %v963_v3 = vld [vmem:[%s1351_s3 + $0x10] sm:$0xff] (!%p189_p2)   ;;  %vm268_vm0 = vcmask (!%p189_p2), 130048   ;;  %vm582_vm1 = vcmask (!%p189_p2), 64512  }
   0x6   : > { %192 = sbr.rel (%p189_p2) target bundleno = 803 (0x323), region = 40  ;;  %p217_p3 = scmp.lt.s32.totalorder (!%p189_p2), %s836_s22, 31  ;;  %886 = vmatprep.subr.bf16.mxu0 (!%p189_p2), %v960_v0  ;;  %v961_v1 = vld [vmem:[%s1351_s3] sm:$0xff] (!%p189_p2)   ;;  %v964_v15 = vld [vmem:[%s1351_s3 + $0x18] sm:$0xff] (!%p189_p2)   ;;  %v966_v23 = vld [vmem:[%s1351_s3 + $0x28] sm:$0xff] (!%p189_p2)  }
   0x7   : > { %887 = vmatpush3.bf16.msra.mxu0 (!%p189_p2), %v960_v0  ;;  %936 = vmatprep.subr.bf16.mxu1 (!%p189_p2), %v961_v1  ;;  %v965_v20 = vld [vmem:[%s1351_s3 + $0x20] sm:$0xff] (!%p189_p2)   ;;  %v967_v31 = vld [vmem:[%s1351_s3 + $0x30] sm:$0xff] (!%p189_p2)   ;;  %v968_v32 = vld [vmem:[%s1351_s3 + $0x38] sm:$0xff] (!%p189_p2)  }
   0x8   : > { %904 = vmatprep.subr.bf16.mxu0 (!%p189_p2), %v961_v1  ;;  %944 = vmatpush3.bf16.msra.mxu1 (!%p189_p2), %v961_v1  ;;  %v840_v33 = vld [vmem:[%s1350_s2] ss:$0 sm:$0xff] (!%p189_p2) }
   0x9   : > { %937 = vmatprep.subr.bf16.mxu1 (!%p189_p2), %v962_v2 }
   0xc   : > { %945 = vmatpush3.bf16.msra.mxu1 (!%p189_p2), %v962_v2 }
   0xd   : > { %s1355_s22 = smov (!%p217_p3, %s836_s22), 31  ;;  %938 = vmatprep.subr.bf16.mxu1 %v963_v3 }
   0xe   : > { %s837_s27 = sshll.u32 %s1355_s22, 3 }
   0xf   : > { %s1096_s30 = scalar_lea.vmem %s1348_s0, %s837_s27  ;;  %s1295_s26 = scalar_lea.vmem %s1353_s5, %s837_s27 }
  0x10   : > { %v229_v4 = vld [vmem:[%s1096_s30] sm:$0xff]  ;;  %v230_v5 = vld [vmem:[%s1096_s30 + $0x8] sm:$0xff]  ;;  %v231_v6 = vld [vmem:[%s1096_s30 + $0x10] sm:$0xff]  ;;  %946 = vmatpush3.bf16.msra.mxu1 %v963_v3 }
  0x11   : > { %v245_v7 = vpack.c.bf16 %v230_v5, %v229_v4  ;;  %v232_v8 = vld [vmem:[%s1096_s30 + $0x18] sm:$0xff]  ;;  %v233_v9 = vld [vmem:[%s1096_s30 + $0x20] sm:$0xff]  ;;  %v234_v10 = vld [vmem:[%s1096_s30 + $0x28] sm:$0xff]  ;;  %939 = vmatprep.subr.bf16.mxu1 %v964_v15 }
  0x12   : > { %v246_v11 = vpack.c.bf16 %v232_v8, %v231_v6  ;;  %v247_v12 = vpack.c.bf16 %v234_v10, %v233_v9  ;;  %v235_v13 = vld [vmem:[%s1096_s30 + $0x30] sm:$0xff]  ;;  %v236_v14 = vld [vmem:[%s1096_s30 + $0x38] sm:$0xff]  ;;  %v237_v16 = vld [vmem:[%s1096_s30 + $0x40] sm:$0xff] }
  0x13   : > { %888 = vmatprep.mubr.msk.bf16.mxu0 %vm268_vm0, %v245_v7  ;;  %v238_v17 = vld [vmem:[%s1096_s30 + $0x48] sm:$0xff]  ;;  %v248_v18 = vpack.c.bf16 %v236_v14, %v235_v13  ;;  %v239_v21 = vld [vmem:[%s1096_s30 + $0x50] sm:$0xff]  ;;  %v240_v22 = vld [vmem:[%s1096_s30 + $0x58] sm:$0xff] }
  0x14   : > { %889 = vmatmul.mubr.msk.bf16.vlgmr.msra.gmra.mrb[0].mxu0 %vm268_vm0, %v246_v11  ;;  %v249_v19 = vpack.c.bf16 %v238_v17, %v237_v16  ;;  %947 = vmatpush3.bf16.msra.mxu1 %v964_v15  ;;  %v241_v24 = vld [vmem:[%s1096_s30 + $0x60] sm:$0xff]  ;;  %v242_v25 = vld [vmem:[%s1096_s30 + $0x68] sm:$0xff]  ;;  %v250_v26 = vpack.c.bf16 %v240_v22, %v239_v21  ;;  %v243_v28 = vld [vmem:[%s1096_s30 + $0x70] sm:$0xff] }
  0x15   : > { %892 = vmatprep.mubr.msk.bf16.mxu0 %vm268_vm0, %v247_v12  ;;  %905 = vmatpush3.bf16.msra.mxu0 %v961_v1  ;;  %v251_v27 = vpack.c.bf16 %v242_v25, %v241_v24  ;;  %v244_v29 = vld [vmem:[%s1096_s30 + $0x78] sm:$0xff] }
  0x16   : > { %906 = vmatprep.subr.bf16.mxu0 %v962_v2  ;;  %940 = vmatprep.subr.bf16.mxu1 %v965_v20  ;;  %v252_v30 = vpack.c.bf16 %v244_v29, %v243_v28 }
  0x18   : > { %948 = vmatpush3.bf16.msra.mxu1 %v965_v20 }
  0x19   : > { %907 = vmatpush3.bf16.msra.mxu0 %v962_v2  ;;  %941 = vmatprep.subr.bf16.mxu1 %v966_v23 }
  0x1a   : > { %908 = vmatprep.subr.bf16.mxu0 %v963_v3 }
  0x1c   : > { %893 = vmatmul.mubr.msk.bf16.gmra.mrb[4].mxu0 %vm268_vm0, %v248_v18  ;;  %949 = vmatpush3.bf16.msra.mxu1 %v966_v23 }
  0x1d   : > { %896 = vmatprep.mubr.msk.bf16.mxu0 %vm268_vm0, %v249_v19  ;;  %909 = vmatpush3.bf16.msra.mxu0 %v963_v3 }
  0x1e   : > { %910 = vmatprep.subr.bf16.mxu0 %v964_v15  ;;  %942 = vmatprep.subr.bf16.mxu1 %v967_v31 }
  0x20   : > { %950 = vmatpush3.bf16.msra.mxu1 %v967_v31 }
  0x21   : > { %911 = vmatpush3.bf16.msra.mxu0 %v964_v15  ;;  %943 = vmatprep.subr.bf16.mxu1 %v968_v32 }
  0x22   : > { %912 = vmatprep.subr.bf16.mxu0 %v965_v20 }
  0x24   : > { %897 = vmatmul.mubr.msk.bf16.gmra.mrb[8].mxu0 %vm268_vm0, %v250_v26  ;;  %951 = vmatpush3.bf16.msra.mxu1 %v968_v32  ;;  %v850_v26 = vld [vmem:[%s1352_s4] ss:$0 sm:$0xff] }
  0x25   : > { %900 = vmatprep.mubr.msk.bf16.mxu0 %vm268_vm0, %v251_v27  ;;  %913 = vmatpush3.bf16.msra.mxu0 %v965_v20 }
  0x26   : > { %914 = vmatprep.subr.bf16.mxu0 %v966_v23 }
  0x29   : > { %915 = vmatpush3.bf16.msra.mxu0 %v966_v23 }
  0x2a   : > { %916 = vmatprep.subr.bf16.mxu0 %v967_v31 }
  0x2c   : > { %901 = vmatmul.mubr.msk.bf16.gmra.mrb[12].mxu0 %vm268_vm0, %v252_v30 }
  0x2d   : > { %917 = vmatpush3.bf16.msra.mxu0 %v967_v31 }
  0x2e   : > { %918 = vmatprep.subr.bf16.mxu0 %v968_v32 }
  0x31   : > { %919 = vmatpush3.bf16.msra.mxu0 %v968_v32 }
  0xe7   : > { %v890_v34 = vpop.f32.mrb[0].mxu0 }
  0xe8   : > { %v336_v35 = vadd.f32 %v890_v34, %v840_v33  ;;  %v327_v36 = vpop.f32.mrb[1].mxu0 }
  0xe9   : > { %v328_v37 = vadd.f32 %v840_v33, %v327_v36  ;;  %v891_v38 = vpop.f32.mrb[2].mxu0 }
  0xea   : > { %v339_v39 = vadd.f32 %v891_v38, %v840_v33  ;;  %v330_v40 = vpop.f32.mrb[3].mxu0  ;;  %v392_v42 = vmax.f32 %v336_v35, 0.0 }
  0xeb   : > { %v331_v41 = vadd.f32 %v840_v33, %v330_v40  ;;  %v390_v44 = vmax.f32 %v328_v37, 0.0 }
  0xec   : > { %v393_v43 = vmax.f32 %v339_v39, 0.0 }
  0xed   : > { %v391_v45 = vmax.f32 %v331_v41, 0.0 }
  0xee   : > { %v407_v46 = vpack.c.bf16 %v393_v43, %v392_v42 }
  0xef   : > { %v406_v47 = vpack.c.bf16 %v391_v45, %v390_v44  ;;  %v894_v48 = vpop.f32.mrb[4].mxu0 }
  0xf0   : > { %v352_v49 = vadd.f32 %v894_v48, %v840_v33  ;;  %v343_v50 = vpop.f32.mrb[5].mxu0 }
  0xf1   : > { %v344_v51 = vadd.f32 %v840_v33, %v343_v50  ;;  %v895_v52 = vpop.f32.mrb[6].mxu0  ;;  %920 = vmatprep.mubr.bf16.mxu0 %v406_v47 }
  0xf2   : > { %v396_v53 = vmax.f32 %v352_v49, 0.0  ;;  %v355_v54 = vadd.f32 %v895_v52, %v840_v33  ;;  %v346_v55 = vpop.f32.mrb[7].mxu0  ;;  %921 = vmatmul.mubr.bf16.vlgmr.msra.gmra.mrb[16].mxu0 %v407_v46 }
  0xf3   : > { %v347_v56 = vadd.f32 %v840_v33, %v346_v55  ;;  %v394_v58 = vmax.f32 %v344_v51, 0.0 }
  0xf4   : > { %v397_v57 = vmax.f32 %v355_v54, 0.0 }
  0xf5   : > { %v395_v59 = vmax.f32 %v347_v56, 0.0 }
  0xf6   : > { %v409_v60 = vpack.c.bf16 %v397_v57, %v396_v53 }
  0xf7   : > { %v898_v61 = vpop.f32.mrb[8].mxu0  ;;  %v408_v62 = vpack.c.bf16 %v395_v59, %v394_v58 }
  0xf8   : > { %v368_v63 = vadd.f32 %v898_v61, %v840_v33  ;;  %v359_v0 = vpop.f32.mrb[9].mxu0 }
  0xf9   : > { %v360_v1 = vadd.f32 %v840_v33, %v359_v0  ;;  %v899_v2 = vpop.f32.mrb[10].mxu0  ;;  %924 = vmatprep.mubr.bf16.mxu1 %v408_v62 }
  0xfa   : > { %v400_v3 = vmax.f32 %v368_v63, 0.0  ;;  %v371_v4 = vadd.f32 %v899_v2, %v840_v33  ;;  %v362_v5 = vpop.f32.mrb[11].mxu0  ;;  %925 = vmatmul.mubr.bf16.vlgmr.msra.gmra.mrb[0].mxu1 %v409_v60 }
  0xfb   : > { %v363_v6 = vadd.f32 %v840_v33, %v362_v5  ;;  %v398_v8 = vmax.f32 %v360_v1, 0.0 }
  0xfc   : > { %v401_v7 = vmax.f32 %v371_v4, 0.0 }
  0xfd   : > { %v399_v9 = vmax.f32 %v363_v6, 0.0 }
  0xfe   : > { %v411_v10 = vpack.c.bf16 %v401_v7, %v400_v3 }
  0xff   : > { %v410_v11 = vpack.c.bf16 %v399_v9, %v398_v8  ;;  %v902_v12 = vpop.f32.mrb[12].mxu0 }
 0x100   : > { %v384_v13 = vadd.f32 %v902_v12, %v840_v33  ;;  %v375_v14 = vpop.f32.mrb[13].mxu0 }
 0x101   : > { %v376_v15 = vadd.f32 %v840_v33, %v375_v14  ;;  %v903_v16 = vpop.f32.mrb[14].mxu0  ;;  %928 = vmatprep.mubr.bf16.mxu1 %v410_v11 }
 0x102   : > { %v404_v17 = vmax.f32 %v384_v13, 0.0  ;;  %v387_v18 = vadd.f32 %v903_v16, %v840_v33  ;;  %v378_v19 = vpop.f32.mrb[15].mxu0  ;;  %929 = vmatmul.mubr.bf16.gmra.mrb[4].mxu1 %v411_v10 }
 0x103   : > { %v379_v20 = vadd.f32 %v840_v33, %v378_v19  ;;  %v402_v22 = vmax.f32 %v376_v15, 0.0 }
 0x104   : > { %v405_v21 = vmax.f32 %v387_v18, 0.0 }
 0x105   : > { %v403_v23 = vmax.f32 %v379_v20, 0.0 }
 0x106   : > { %v413_v24 = vpack.c.bf16 %v405_v21, %v404_v17 }
 0x107   : > { %v412_v25 = vpack.c.bf16 %v403_v23, %v402_v22 }
 0x109   : > { %932 = vmatprep.mubr.bf16.mxu1 %v412_v25 }
 0x10a   : > { %933 = vmatmul.mubr.bf16.gmra.mrb[8].mxu1 %v413_v24 }
 0x1c5   : > { %v922_v27 = vpop.f32.mrb[16].mxu0 }
 0x1c6   : > { %v1146_v28 = vadd.f32 %v922_v27, %v850_v26  ;;  %v519_v29 = vpop.f32.mrb[17].mxu0 }
 0x1c7   : > { %v1148_v30 = vadd.f32 %v850_v26, %v519_v29  ;;  %v923_v31 = vpop.f32.mrb[18].mxu0 }
 0x1c8   : > { %v1150_v32 = vadd.f32 %v923_v31, %v850_v26  ;;  %v522_v33 = vpop.f32.mrb[19].mxu0  ;;  %v589_v34 = vsel %vm582_vm1, %v1146_v28, -inf }
 0x1c9   : > { %v1154_v35 = vadd.f32 %v850_v26, %v522_v33  ;;  %590 = vmax.xlane.f32.xlu1 %v589_v34  ;;  %v583_v36 = vsel %vm582_vm1, %v1148_v30, -inf }
 0x1ca   : > { %584 = vmax.xlane.f32.xlu0 %v583_v36  ;;  %v592_v37 = vsel %vm582_vm1, %v1150_v32, -inf }
 0x1cb   : > { %v586_v39 = vsel %vm582_vm1, %v1154_v35, -inf }
 0x1cd   : > { %v926_v38 = vpop.f32.mrb[0].mxu1  ;;  %593 = vmax.xlane.f32.xlu1 %v592_v37 }
 0x1ce   : > { %v1162_v40 = vadd.f32 %v926_v38, %v850_v26  ;;  %v535_v41 = vpop.f32.mrb[1].mxu1  ;;  %587 = vmax.xlane.f32.xlu0 %v586_v39 }
 0x1cf   : > { %v927_v42 = vpop.f32.mrb[2].mxu1  ;;  %v1168_v46 = vadd.f32 %v850_v26, %v535_v41 }
 0x1d0   : > { %v1164_v43 = vadd.f32 %v927_v42, %v850_v26  ;;  %v538_v44 = vpop.f32.mrb[3].mxu1  ;;  %v601_v45 = vsel %vm582_vm1, %v1162_v40, -inf }
 0x1d1   : > { %v1170_v47 = vadd.f32 %v850_v26, %v538_v44  ;;  %v595_v50 = vsel %vm582_vm1, %v1168_v46, -inf }
 0x1d2   : > { %602 = vmax.xlane.f32.xlu0 %v601_v45  ;;  %v604_v48 = vsel %vm582_vm1, %v1164_v43, -inf }
 0x1d3   : > { %605 = vmax.xlane.f32.xlu1 %v604_v48  ;;  %v598_v53 = vsel %vm582_vm1, %v1170_v47, -inf }
 0x1d5   : > { %v930_v49 = vpop.f32.mrb[4].mxu1 }
 0x1d6   : > { %v1176_v51 = vadd.f32 %v930_v49, %v850_v26  ;;  %v551_v52 = vpop.f32.mrb[5].mxu1  ;;  %596 = vmax.xlane.f32.xlu0 %v595_v50 }
 0x1d7   : > { %v931_v54 = vpop.f32.mrb[6].mxu1  ;;  %599 = vmax.xlane.f32.xlu1 %v598_v53  ;;  %v1184_v58 = vadd.f32 %v850_v26, %v551_v52 }
 0x1d8   : > { %v1180_v55 = vadd.f32 %v931_v54, %v850_v26  ;;  %v554_v56 = vpop.f32.mrb[7].mxu1  ;;  %v613_v57 = vsel %vm582_vm1, %v1176_v51, -inf }
 0x1d9   : > { %v1186_v59 = vadd.f32 %v850_v26, %v554_v56  ;;  %v607_v62 = vsel %vm582_vm1, %v1184_v58, -inf }
 0x1da   : > { %614 = vmax.xlane.f32.xlu0 %v613_v57  ;;  %v616_v60 = vsel %vm582_vm1, %v1180_v55, -inf }
 0x1db   : > { %617 = vmax.xlane.f32.xlu1 %v616_v60  ;;  %v610_v0 = vsel %vm582_vm1, %v1186_v59, -inf }
 0x1dd   : > { %v934_v61 = vpop.f32.mrb[8].mxu1 }
 0x1de   : > { %v567_v63 = vpop.f32.mrb[9].mxu1  ;;  %608 = vmax.xlane.f32.xlu0 %v607_v62  ;;  %v1196_v4 = vadd.f32 %v934_v61, %v850_v26 }
 0x1df   : > { %v1194_v1 = vadd.f32 %v850_v26, %v567_v63  ;;  %v935_v2 = vpop.f32.mrb[10].mxu1  ;;  %611 = vmax.xlane.f32.xlu1 %v610_v0 }
 0x1e0   : > { %v570_v3 = vpop.f32.mrb[11].mxu1  ;;  %v1202_v7 = vadd.f32 %v935_v2, %v850_v26  ;;  %v625_v9 = vsel %vm582_vm1, %v1196_v4, -inf }
 0x1e1   : > { %v1198_v5 = vadd.f32 %v850_v26, %v570_v3  ;;  %v619_v6 = vsel %vm582_vm1, %v1194_v1, -inf }
 0x1e2   : > { %620 = vmax.xlane.f32.xlu0 %v619_v6  ;;  %v628_v10 = vsel %vm582_vm1, %v1202_v7, -inf }
 0x1e3   : > { %v622_v8 = vsel %vm582_vm1, %v1198_v5, -inf }
 0x1e4   : > { %623 = vmax.xlane.f32.xlu1 %v622_v8 }
 0x1e6   : > { %626 = vmax.xlane.f32.xlu0 %v625_v9 }
 0x1e8   : > { %629 = vmax.xlane.f32.xlu1 %v628_v10 }
 0x256   : > { %v591_v11 = vpop.xlane.xlu1 %590 }
 0x257   : > { %v633_v12 = vsub.f32 %v1146_v28, %v591_v11  ;;  %v585_v13 = vpop.xlane.xlu0 %584 }
 0x258   : > { %v631_v14 = vsub.f32 %v1148_v30, %v585_v13 }
 0x259   : > { %v651_v15 = vmul.f32 1.442695, %v633_v12 }
 0x25a   : > { %v647_v16 = vmul.f32 1.442695, %v631_v14  ;;  %v594_v17 = vpop.xlane.xlu1 %593 }
 0x25b   : > { %969 = vpow2.f32 %v651_v15  ;;  %v634_v18 = vsub.f32 %v1150_v32, %v594_v17  ;;  %v588_v19 = vpop.xlane.xlu0 %587 }
 0x25c   : > { %v632_v20 = vsub.f32 %v1154_v35, %v588_v19  ;;  %971 = vpow2.f32 %v647_v16 }
 0x25d   : > { %v653_v21 = vmul.f32 1.442695, %v634_v18 }
 0x25e   : > { %v649_v22 = vmul.f32 1.442695, %v632_v20 }
 0x25f   : > { %973 = vpow2.f32 %v653_v21  ;;  %v603_v23 = vpop.xlane.xlu0 %602 }
 0x260   : > { %v637_v24 = vsub.f32 %v1162_v40, %v603_v23  ;;  %v606_v25 = vpop.xlane.xlu1 %605  ;;  %975 = vpow2.f32 %v649_v22 }
 0x261   : > { %v638_v26 = vsub.f32 %v1164_v43, %v606_v25 }
 0x262   : > { %v659_v27 = vmul.f32 1.442695, %v637_v24 }
 0x263   : > { %v661_v28 = vmul.f32 1.442695, %v638_v26  ;;  %v597_v29 = vpop.xlane.xlu0 %596 }
 0x264   : > { %977 = vpow2.f32 %v659_v27  ;;  %v635_v30 = vsub.f32 %v1168_v46, %v597_v29  ;;  %v600_v31 = vpop.xlane.xlu1 %599 }
 0x265   : > { %v1217_v32 = vpop.eup %969  ;;  %979 = vpow2.f32 %v661_v28  ;;  %v636_v33 = vsub.f32 %v1170_v47, %v600_v31 }
 0x266   : > { %v655_v34 = vmul.f32 1.442695, %v635_v30  ;;  %v685_v35 = vsel %vm582_vm1, %v1217_v32, 0.0  ;;  %v1222_v36 = vpop.eup %971 }
 0x267   : > { %v657_v37 = vmul.f32 1.442695, %v636_v33  ;;  %686 = vadd.xlane.f32.xlu0 %v685_v35  ;;  %v615_v38 = vpop.xlane.xlu0 %614  ;;  %v679_v45 = vsel %vm582_vm1, %v1222_v36, 0.0 }
 0x268   : > { %981 = vpow2.f32 %v655_v34  ;;  %v641_v39 = vsub.f32 %v1176_v51, %v615_v38  ;;  %v618_v40 = vpop.xlane.xlu1 %617 }
 0x269   : > { %v1225_v41 = vpop.eup %973  ;;  %983 = vpow2.f32 %v657_v37  ;;  %v642_v42 = vsub.f32 %v1180_v55, %v618_v40 }
 0x26a   : > { %v667_v43 = vmul.f32 1.442695, %v641_v39  ;;  %v688_v44 = vsel %vm582_vm1, %v1225_v41, 0.0  ;;  %v1232_v46 = vpop.eup %975 }
 0x26b   : > { %v669_v47 = vmul.f32 1.442695, %v642_v42  ;;  %689 = vadd.xlane.f32.xlu1 %v688_v44  ;;  %680 = vadd.xlane.f32.xlu0 %v679_v45  ;;  %v609_v48 = vpop.xlane.xlu0 %608  ;;  %v682_v54 = vsel %vm582_vm1, %v1232_v46, 0.0 }
 0x26c   : > { %985 = vpow2.f32 %v667_v43  ;;  %v639_v49 = vsub.f32 %v1184_v58, %v609_v48  ;;  %v612_v50 = vpop.xlane.xlu1 %611 }
 0x26d   : > { %987 = vpow2.f32 %v669_v47  ;;  %v640_v51 = vsub.f32 %v1186_v59, %v612_v50 }
 0x26e   : > { %v1236_v52 = vpop.eup %977  ;;  %v663_v53 = vmul.f32 1.442695, %v639_v49 }
 0x26f   : > { %v1240_v55 = vpop.eup %979  ;;  %v665_v56 = vmul.f32 1.442695, %v640_v51  ;;  %683 = vadd.xlane.f32.xlu1 %v682_v54  ;;  %v621_v57 = vpop.xlane.xlu0 %620  ;;  %v697_v60 = vsel %vm582_vm1, %v1236_v52, 0.0 }
 0x270   : > { %989 = vpow2.f32 %v663_v53  ;;  %v643_v58 = vsub.f32 %v1194_v1, %v621_v57  ;;  %698 = vadd.xlane.f32.xlu0 %v697_v60  ;;  %v700_v0 = vsel %vm582_vm1, %v1240_v55, 0.0 }
 0x271   : > { %991 = vpow2.f32 %v665_v56  ;;  %v624_v59 = vpop.xlane.xlu1 %623 }
 0x272   : > { %v1245_v61 = vpop.eup %981  ;;  %v671_v62 = vmul.f32 1.442695, %v643_v58  ;;  %v644_v63 = vsub.f32 %v1198_v5, %v624_v59 }
 0x273   : > { %v1250_v2 = vpop.eup %983  ;;  %701 = vadd.xlane.f32.xlu1 %v700_v0  ;;  %v627_v3 = vpop.xlane.xlu0 %626  ;;  %v691_v6 = vsel %vm582_vm1, %v1245_v61, 0.0 }
 0x274   : > { %993 = vpow2.f32 %v671_v62  ;;  %v673_v1 = vmul.f32 1.442695, %v644_v63  ;;  %v645_v8 = vsub.f32 %v1196_v4, %v627_v3  ;;  %692 = vadd.xlane.f32.xlu0 %v691_v6  ;;  %v694_v12 = vsel %vm582_vm1, %v1250_v2, 0.0 }
 0x275   : > { %v630_v9 = vpop.xlane.xlu1 %629 }
 0x276   : > { %v1255_v10 = vpop.eup %985  ;;  %995 = vpow2.f32 %v673_v1  ;;  %v675_v5 = vmul.f32 1.442695, %v645_v8  ;;  %v646_v11 = vsub.f32 %v1202_v7, %v630_v9 }
 0x277   : > { %v1260_v13 = vpop.eup %987  ;;  %695 = vadd.xlane.f32.xlu1 %v694_v12  ;;  %v709_v14 = vsel %vm582_vm1, %v1255_v10, 0.0 }
 0x278   : > { %997 = vpow2.f32 %v675_v5  ;;  %v677_v15 = vmul.f32 1.442695, %v646_v11  ;;  %710 = vadd.xlane.f32.xlu0 %v709_v14  ;;  %v712_v16 = vsel %vm582_vm1, %v1260_v13, 0.0 }
 0x27a   : > { %v1264_v4 = vpop.eup %989  ;;  %999 = vpow2.f32 %v677_v15 }
 0x27b   : > { %v1268_v17 = vpop.eup %991  ;;  %713 = vadd.xlane.f32.xlu1 %v712_v16  ;;  %v703_v7 = vsel %vm582_vm1, %v1264_v4, 0.0 }
 0x27c   : > { %704 = vadd.xlane.f32.xlu0 %v703_v7  ;;  %v706_v19 = vsel %vm582_vm1, %v1268_v17, 0.0 }
 0x27e   : > { %v1272_v18 = vpop.eup %993 }
 0x27f   : > { %707 = vadd.xlane.f32.xlu1 %v706_v19  ;;  %v715_v20 = vsel %vm582_vm1, %v1272_v18, 0.0 }
 0x280   : > { %v1278_v21 = vpop.eup %995  ;;  %716 = vadd.xlane.f32.xlu0 %v715_v20 }
 0x281   : > { %v718_v22 = vsel %vm582_vm1, %v1278_v21, 0.0 }
 0x282   : > { %v1282_v23 = vpop.eup %997 }
 0x283   : > { %719 = vadd.xlane.f32.xlu1 %v718_v22  ;;  %v721_v24 = vsel %vm582_vm1, %v1282_v23, 0.0 }
 0x284   : > { %v1286_v25 = vpop.eup %999  ;;  %722 = vadd.xlane.f32.xlu0 %v721_v24 }
 0x285   : > { %v724_v26 = vsel %vm582_vm1, %v1286_v25, 0.0 }
 0x287   : > { %725 = vadd.xlane.f32.xlu1 %v724_v26 }
 0x2f4   : > { %v687_v27 = vpop.xlane.xlu0 %686 }
 0x2f5   : > { %1001 = vrcp.f32 %v687_v27 }
 0x2f8   : > { %v690_v28 = vpop.xlane.xlu1 %689  ;;  %v681_v29 = vpop.xlane.xlu0 %680 }
 0x2f9   : > { %1003 = vrcp.f32 %v690_v28 }
 0x2fa   : > { %1005 = vrcp.f32 %v681_v29 }
 0x2fc   : > { %v684_v30 = vpop.xlane.xlu1 %683 }
 0x2fd   : > { %1007 = vrcp.f32 %v684_v30  ;;  %v699_v31 = vpop.xlane.xlu0 %698 }
 0x2fe   : > { %1009 = vrcp.f32 %v699_v31 }
 0x2ff   : > { %v1002_v33 = vpop.eup %1001 }
 0x300   : > { %v745_v34 = vmul.f32 %v1002_v33, %v1217_v32  ;;  %v702_v35 = vpop.xlane.xlu1 %701 }
 0x301   : > { %1011 = vrcp.f32 %v702_v35  ;;  %v693_v37 = vpop.xlane.xlu0 %692 }
 0x302   : > { %761 = vst.msk [vmem:[%s1295_s26 + $0x10] sm:$0xff] %vm582_vm1, %v745_v34  ;;  %1013 = vrcp.f32 %v693_v37 }
 0x303   : > { %v1004_v38 = vpop.eup %1003 }
 0x304   : > { %v1006_v39 = vpop.eup %1005  ;;  %v746_v40 = vmul.f32 %v1004_v38, %v1225_v41  ;;  %v696_v42 = vpop.xlane.xlu1 %695 }
 0x305   : > { %v743_v43 = vmul.f32 %v1006_v39, %v1222_v36  ;;  %1015 = vrcp.f32 %v696_v42  ;;  %v711_v44 = vpop.xlane.xlu0 %710 }
 0x306   : > { %762 = vst.msk [vmem:[%s1295_s26 + $0x18] sm:$0xff] %vm582_vm1, %v746_v40  ;;  %1017 = vrcp.f32 %v711_v44 }
 0x307   : > { %v1008_v32 = vpop.eup %1007  ;;  %759 = vst.msk [vmem:[%s1295_s26] sm:$0xff] %vm582_vm1, %v743_v43 }
 0x308   : > { %v1010_v45 = vpop.eup %1009  ;;  %v744_v47 = vmul.f32 %v1008_v32, %v1232_v46  ;;  %v714_v48 = vpop.xlane.xlu1 %713 }
 0x309   : > { %v749_v49 = vmul.f32 %v1010_v45, %v1236_v52  ;;  %1019 = vrcp.f32 %v714_v48  ;;  %v705_v41 = vpop.xlane.xlu0 %704 }
 0x30a   : > { %760 = vst.msk [vmem:[%s1295_s26 + $0x8] sm:$0xff] %vm582_vm1, %v744_v47  ;;  %1021 = vrcp.f32 %v705_v41 }
 0x30b   : > { %v1012_v36 = vpop.eup %1011  ;;  %765 = vst.msk [vmem:[%s1295_s26 + $0x30] sm:$0xff] %vm582_vm1, %v749_v49 }
 0x30c   : > { %v1014_v50 = vpop.eup %1013  ;;  %v750_v51 = vmul.f32 %v1012_v36, %v1240_v55  ;;  %v708_v53 = vpop.xlane.xlu1 %707 }
 0x30d   : > { %v747_v54 = vmul.f32 %v1014_v50, %v1245_v61  ;;  %1023 = vrcp.f32 %v708_v53  ;;  %v717_v46 = vpop.xlane.xlu0 %716 }
 0x30e   : > { %766 = vst.msk [vmem:[%s1295_s26 + $0x38] sm:$0xff] %vm582_vm1, %v750_v51  ;;  %1025 = vrcp.f32 %v717_v46 }
 0x30f   : > { %v1016_v52 = vpop.eup %1015  ;;  %763 = vst.msk [vmem:[%s1295_s26 + $0x20] sm:$0xff] %vm582_vm1, %v747_v54 }
 0x310   : > { %v1018_v56 = vpop.eup %1017  ;;  %v748_v57 = vmul.f32 %v1016_v52, %v1250_v2  ;;  %v720_v60 = vpop.xlane.xlu1 %719 }
 0x311   : > { %v753_v55 = vmul.f32 %v1018_v56, %v1255_v10  ;;  %1027 = vrcp.f32 %v720_v60  ;;  %v723_v58 = vpop.xlane.xlu0 %722 }
 0x312   : > { %764 = vst.msk [vmem:[%s1295_s26 + $0x28] sm:$0xff] %vm582_vm1, %v748_v57  ;;  %1029 = vrcp.f32 %v723_v58 }
 0x313   : > { %v1020_v59 = vpop.eup %1019  ;;  %769 = vst.msk [vmem:[%s1295_s26 + $0x50] sm:$0xff] %vm582_vm1, %v753_v55 }
 0x314   : > { %v1022_v61 = vpop.eup %1021  ;;  %v754_v62 = vmul.f32 %v1020_v59, %v1260_v13  ;;  %v726_v63 = vpop.xlane.xlu1 %725 }
 0x315   : > { %v751_v0 = vmul.f32 %v1022_v61, %v1264_v4  ;;  %1031 = vrcp.f32 %v726_v63 }
 0x316   : > { %770 = vst.msk [vmem:[%s1295_s26 + $0x58] sm:$0xff] %vm582_vm1, %v754_v62 }
 0x317   : > { %v1024_v2 = vpop.eup %1023  ;;  %767 = vst.msk [vmem:[%s1295_s26 + $0x40] sm:$0xff] %vm582_vm1, %v751_v0 }
 0x318   : > { %v1026_v3 = vpop.eup %1025  ;;  %v752_v6 = vmul.f32 %v1024_v2, %v1268_v17 }
 0x319   : > { %v755_v1 = vmul.f32 %v1026_v3, %v1272_v18 }
 0x31a   : > { %768 = vst.msk [vmem:[%s1295_s26 + $0x48] sm:$0xff] %vm582_vm1, %v752_v6 }
 0x31b   : > { %v1028_v8 = vpop.eup %1027  ;;  %771 = vst.msk [vmem:[%s1295_s26 + $0x60] sm:$0xff] %vm582_vm1, %v755_v1 }
 0x31c   : > { %v1030_v9 = vpop.eup %1029  ;;  %v756_v10 = vmul.f32 %v1028_v8, %v1278_v21 }
 0x31d   : > { %v757_v5 = vmul.f32 %v1030_v9, %v1282_v23 }
 0x31e   : > { %772 = vst.msk [vmem:[%s1295_s26 + $0x68] sm:$0xff] %vm582_vm1, %v756_v10 }
 0x31f   : > { %v1032_v11 = vpop.eup %1031  ;;  %773 = vst.msk [vmem:[%s1295_s26 + $0x70] sm:$0xff] %vm582_vm1, %v757_v5 }
 0x320   : > { %v758_v12 = vmul.f32 %v1032_v11, %v1286_v25 }
 0x322   : > { %774 = vst.msk [vmem:[%s1295_s26 + $0x78] sm:$0xff] %vm582_vm1, %v758_v12 }
 0x323 PF: > { %s15_s18 = sadd.s32 1, %s1039_s18  }
 0x324   : > { %p12_p4 = scmp.ge.s32.totalorder %s15_s18, 4  }
 0x326   :  { %14 = sbr.rel (!%p12_p4) target bundleno = 1 (0x1), region = 70 }

</bundles_post_ra>
